<compile_context>
chip_gen: v7x
topology: tpu7x:2x2x1
jax: 0.10.0
libtpu: 0.0.40
codegen_flags: <defaults>
</compile_context>

<pallas_src>
import functools

import jax
import jax.numpy as jnp
from jax.experimental import pallas as pl
from jax.experimental.pallas import tpu as pltpu

HEAD_SCALE = 64.0   # scale used by normalized-softmax style headers
NORM_EPS = 1e-12    # F.normalize default eps
LANE = 128
VMEM_LIMIT = 48 * 1024 * 1024   # fits v7x (64 MiB) with headroom; < v5e/v6e 128 MiB


def _round_up(x, m):
    return (x + m - 1) // m * m


# ---------------------------------------------------------------------------
# Kernel 1: fused backbone proxy
#   grid = (batch, row_tiles)  -- row tiles over the H*W pixel axis
#   per step: im2col-matmul conv3x3 + bias + PReLU, accumulate GAP into VMEM
#   scratch; on the last row tile: GAP -> FC -> embedding (single HBM store).
# ---------------------------------------------------------------------------
def backbone_kernel(p_ref, w_ref, b_ref, a_ref, wf_ref, bf_ref, o_ref,
                    gap_acc, *, inv_hw):
    r = pl.program_id(1)

    @pl.when(r == 0)
    def _():
        gap_acc[...] = jnp.zeros_like(gap_acc)

    patches = p_ref[0]                                         # (TM, 9*Cin) bf16
    conv = jnp.dot(patches, w_ref[...],                        # bf16 x bf16
                   preferred_element_type=jnp.float32)         # (TM, Cout) f32
    conv = conv + b_ref[...]                                   # (1, Cout) bcast
    act = jnp.where(conv > 0.0, conv, a_ref[...] * conv)       # PReLU
    gap_acc[...] += jnp.sum(act, axis=0, keepdims=True)        # (1, Cout)

    @pl.when(r == pl.num_programs(1) - 1)
    def _():
        gap = gap_acc[...] * inv_hw                            # mean over H*W
        emb = jnp.dot(gap, wf_ref[...],
                      preferred_element_type=jnp.float32) + bf_ref[...]
        o_ref[0] = emb                                         # (1, F)


# ---------------------------------------------------------------------------
# Kernel 2: F.normalize(x) + normalized-weight "Softmax" header (cos * s)
#   grid = (class_tiles,) -- lane-dense 128-wide class tiles; weight norm is
#   computed once per class tile (never per batch tile).
# ---------------------------------------------------------------------------
def head_kernel(e_ref, w_ref, o_ref, *, scale):
    e = e_ref[...]                                             # (N, F) f32
    inv_e = jax.lax.rsqrt(
        jnp.maximum(jnp.sum(e * e, axis=-1, keepdims=True), NORM_EPS * NORM_EPS))
    feat = e * inv_e                                           # == F.normalize

    w = w_ref[...]                                             # (F, TC) f32
    inv_w = jax.lax.rsqrt(
        jnp.maximum(jnp.sum(w * w, axis=0, keepdims=True), NORM_EPS * NORM_EPS))
    w_n = w * inv_w

    cos = jnp.dot(feat.astype(jnp.bfloat16), w_n.astype(jnp.bfloat16),
                  preferred_element_type=jnp.float32)          # (N, TC)
    o_ref[...] = cos * scale


# ---------------------------------------------------------------------------
# Parameters (deterministic, synthetic)
# ---------------------------------------------------------------------------
def init_params(key, in_ch=3, conv_ch=8, num_features=32, num_classes=10):
    k1, k2, k3 = jax.random.split(key, 3)
    return {
        "conv_w": jax.random.normal(k1, (3, 3, in_ch, conv_ch), jnp.float32) * 0.1,
        "conv_b": jnp.zeros((1, conv_ch), jnp.float32),
        "prelu_a": jnp.full((1, conv_ch), 0.25, jnp.float32),
        "fc_w": jax.random.normal(k2, (num_features, conv_ch), jnp.float32) * 0.1,
        "fc_b": jnp.zeros((1, num_features), jnp.float32),
        "head_w": jax.random.normal(k3, (num_classes, num_features), jnp.float32) * 0.1,
    }


# ---------------------------------------------------------------------------
# Forward wrapper
# ---------------------------------------------------------------------------
def softmax_drop_net_forward(params, img_nchw, label, mode="single"):
    if mode != "single":
        # TODO(synk): 'double' mode needs backbone.double_forward (two dropout
        # passes over the same features); not reproduced here.
        raise NotImplementedError("only mode='single' is implemented")
    del label  # plain (margin-free) Softmax header ignores the label

    # NCHW (PyTorch) -> NHWC, then wrapper-side layout plumbing.
    x = jnp.transpose(img_nchw, (0, 2, 3, 1)).astype(jnp.float32)
    N, H, W, Cin = x.shape
    conv_w = params["conv_w"]                      # (3, 3, Cin, Cout)
    Cout = conv_w.shape[-1]
    fc_w = params["fc_w"]                          # (F, Cout)  (nn.Linear layout)
    F_dim = fc_w.shape[0]
    head_w = params["head_w"]                      # (num_classes, F)
    num_classes = head_w.shape[0]
    K = 9 * Cin
    M = H * W

    # im2col patch slab (N, H*W, 9*Cin): turns the conv into one MXU matmul.
    # TODO(synk): for production image sizes, build the patches inside the
    # kernel from overlapping row blocks (halo index_map) instead of
    # materializing the 9x slab in HBM.
    xp = jnp.pad(x, ((0, 0), (1, 1), (1, 1), (0, 0)))
    cols = [xp[:, kh:kh + H, kw:kw + W, :] for kh in range(3) for kw in range(3)]
    patches = jnp.concatenate(cols, axis=-1).reshape(N, M, K)
    patches = patches.astype(jnp.bfloat16)                     # halve DMA bytes
    conv_w2 = conv_w.reshape(K, Cout).astype(jnp.bfloat16)     # (9*Cin, Cout)
    fc_wT = fc_w.T                                             # (Cout, F) lane-dense RHS

    # Row-tile size: largest that divides the pixel axis (full axis otherwise).
    TM = M
    for cand in (512, 256, 128):
        if M % cand == 0:
            TM = cand
            break

    emb3 = pl.pallas_call(
        functools.partial(backbone_kernel, inv_hw=1.0 / float(M)),
        out_shape=jax.ShapeDtypeStruct((N, 1, F_dim), jnp.float32),
        grid=(N, M // TM),
        in_specs=[
            pl.BlockSpec((1, TM, K), lambda b, r: (b, r, 0)),
            pl.BlockSpec((K, Cout), lambda b, r: (0, 0)),
            pl.BlockSpec((1, Cout), lambda b, r: (0, 0)),
            pl.BlockSpec((1, Cout), lambda b, r: (0, 0)),
            pl.BlockSpec((Cout, F_dim), lambda b, r: (0, 0)),
            pl.BlockSpec((1, F_dim), lambda b, r: (0, 0)),
        ],
        out_specs=pl.BlockSpec((1, 1, F_dim), lambda b, r: (b, 0, 0)),
        scratch_shapes=[pltpu.VMEM((1, Cout), jnp.float32)],
        compiler_params=pltpu.CompilerParams(
            dimension_semantics=("parallel", "arbitrary"),
            vmem_limit_bytes=VMEM_LIMIT),
    )(patches, conv_w2, params["conv_b"], params["prelu_a"], fc_wT, params["fc_b"])
    emb = emb3.reshape(N, F_dim)

    # --- F.normalize + normalized-weight header (lane-dense, 128-padded) ---
    C_pad = _round_up(num_classes, LANE)
    head_wT = jnp.zeros((F_dim, C_pad), jnp.float32).at[:, :num_classes].set(head_w.T)
    TC = LANE
    theta_pad = pl.pallas_call(
        functools.partial(head_kernel, scale=HEAD_SCALE),
        out_shape=jax.ShapeDtypeStruct((N, C_pad), jnp.float32),
        grid=(C_pad // TC,),
        in_specs=[
            pl.BlockSpec((N, F_dim), lambda c: (0, 0)),
            pl.BlockSpec((F_dim, TC), lambda c: (0, c)),
        ],
        out_specs=pl.BlockSpec((N, TC), lambda c: (0, c)),
        compiler_params=pltpu.CompilerParams(
            dimension_semantics=("parallel",),
            vmem_limit_bytes=VMEM_LIMIT),
    )(emb, head_wT)
    return theta_pad[:, :num_classes]


# ---------------------------------------------------------------------------
# Pure-JAX reference (for a loose numerical check; kernels use bf16 matmuls)
# ---------------------------------------------------------------------------
def _reference_forward(params, img_nchw):
    x = jnp.transpose(img_nchw, (0, 2, 3, 1)).astype(jnp.float32)
    conv = jax.lax.conv_general_dilated(
        x, params["conv_w"], window_strides=(1, 1), padding="SAME",
        dimension_numbers=("NHWC", "HWIO", "NHWC"))
    conv = conv + params["conv_b"].reshape(1, 1, 1, -1)
    act = jnp.where(conv > 0, conv, params["prelu_a"].reshape(1, 1, 1, -1) * conv)
    gap = jnp.mean(act, axis=(1, 2))                               # (N, Cout)
    emb = gap @ params["fc_w"].T + params["fc_b"]                  # (N, F)
    feat = emb / jnp.maximum(
        jnp.linalg.norm(emb, axis=1, keepdims=True), NORM_EPS)
    w_n = params["head_w"] / jnp.maximum(
        jnp.linalg.norm(params["head_w"], axis=1, keepdims=True), NORM_EPS)
    return (feat @ w_n.T) * HEAD_SCALE


if __name__ == "__main__":
    key = jax.random.PRNGKey(0)
    k_img, k_par = jax.random.split(key)

    batch, in_ch, spatial = 2, 3, 16
    num_features, num_classes = 32, 10

    img = jax.random.normal(k_img, (batch, in_ch, spatial, spatial), jnp.float32)
    label = jnp.arange(batch, dtype=jnp.int32) % num_classes

    params = init_params(k_par, in_ch=in_ch, conv_ch=8,
                         num_features=num_features, num_classes=num_classes)

    theta = softmax_drop_net_forward(params, img, label, mode="single")
    theta = jax.block_until_ready(theta)

    assert theta.shape == (batch, num_classes)
    assert bool(jnp.all(jnp.isfinite(theta)))

    theta_ref = _reference_forward(params, img)
    max_err = float(jnp.max(jnp.abs(theta - theta_ref)))
    assert max_err < 2.0, f"mismatch vs reference: max|diff|={max_err}"

    print("KERNEL_OK")
</pallas_src>

<mosaic_0001>
module attributes {stable_mosaic.version = 11 : i64} {
  func.func @backbone_kernel(%arg0: i32, %arg1: i32, %arg2: memref<1x256x27xbf16, #tpu.memory_space<vmem>>, %arg3: memref<27x8xbf16, #tpu.memory_space<vmem>>, %arg4: memref<1x8xf32, #tpu.memory_space<vmem>>, %arg5: memref<1x8xf32, #tpu.memory_space<vmem>>, %arg6: memref<8x32xf32, #tpu.memory_space<vmem>>, %arg7: memref<1x32xf32, #tpu.memory_space<vmem>>, %arg8: memref<1x1x32xf32, #tpu.memory_space<vmem>>, %arg9: memref<1x8xf32, #tpu.memory_space<vmem>>) attributes {dimension_semantics = [#tpu.dimension_semantics<parallel>, #tpu.dimension_semantics<arbitrary>], iteration_bounds = array<i64: 2, 1>, scalar_prefetch = 0 : i64, scratch_operands = 1 : i64, tpu.core_type = #tpu.core_type<tc>, window_params = [{transform_indices = @transform_0, window_bounds = array<i64: 1, 256, 27>}, {pipeline_mode = #tpu.pipeline_mode<synchronous>, transform_indices = @transform_1, window_bounds = array<i64: 27, 8>}, {pipeline_mode = #tpu.pipeline_mode<synchronous>, transform_indices = @transform_2, window_bounds = array<i64: 1, 8>}, {pipeline_mode = #tpu.pipeline_mode<synchronous>, transform_indices = @transform_3, window_bounds = array<i64: 1, 8>}, {pipeline_mode = #tpu.pipeline_mode<synchronous>, transform_indices = @transform_4, window_bounds = array<i64: 8, 32>}, {pipeline_mode = #tpu.pipeline_mode<synchronous>, transform_indices = @transform_5, window_bounds = array<i64: 1, 32>}, {transform_indices = @transform_6, window_bounds = array<i64: 1, 1, 32>}]} {
    %c0_i32 = arith.constant 0 : i32
    %0 = arith.cmpi eq, %arg1, %c0_i32 : i32
    %1 = arith.extui %0 : i1 to i32
    %c0_i32_0 = arith.constant 0 : i32
    %2 = arith.cmpi ne, %1, %c0_i32_0 : i32
    scf.if %2 {
      %cst_17 = arith.constant 0.000000e+00 : f32
      %24 = vector.broadcast %cst_17 : f32 to vector<1x8xf32>
      %c0_18 = arith.constant 0 : index
      %c0_19 = arith.constant 0 : index
      %25 = vector.load %arg9[%c0_18, %c0_19] : memref<1x8xf32, #tpu.memory_space<vmem>>, vector<1x8xf32>
      tpu.vector_store %arg9[%c0_18, %c0_19], %24 {strides = array<i32>} : memref<1x8xf32, #tpu.memory_space<vmem>>, vector<1x8xf32>,
    } else {
    }
    %c0 = arith.constant 0 : index
    %c0_1 = arith.constant 0 : index
    %c0_2 = arith.constant 0 : index
    %3 = vector.load %arg2[%c0, %c0_1, %c0_2] : memref<1x256x27xbf16, #tpu.memory_space<vmem>>, vector<1x256x27xbf16>
    %4 = vector.shape_cast %3 : vector<1x256x27xbf16> to vector<256x27xbf16>
    %c0_3 = arith.constant 0 : index
    %c0_4 = arith.constant 0 : index
    %5 = vector.load %arg3[%c0_3, %c0_4] : memref<27x8xbf16, #tpu.memory_space<vmem>>, vector<27x8xbf16>
    %cst = arith.constant dense<0.000000e+00> : vector<256x8xf32>
    %6 = tpu.matmul %4, %5, %cst {dimension_numbers = #tpu.dot_dimension_numbers<[1], [0], [0], [1], [0, 0, 1, 1], [], []>} : vector<256x27xbf16>, vector<27x8xbf16>, vector<256x8xf32> -> vector<256x8xf32>
    %c0_5 = arith.constant 0 : index
    %c0_6 = arith.constant 0 : index
    %7 = vector.load %arg4[%c0_5, %c0_6] : memref<1x8xf32, #tpu.memory_space<vmem>>, vector<1x8xf32>
    %8 = vector.broadcast %7 : vector<1x8xf32> to vector<256x8xf32>
    %9 = arith.addf %6, %8 : vector<256x8xf32>
    %cst_7 = arith.constant 0.000000e+00 : f32
    %10 = vector.broadcast %cst_7 : f32 to vector<256x8xf32>
    %11 = arith.cmpf ogt, %9, %10 : vector<256x8xf32>
    %c0_8 = arith.constant 0 : index
    %c0_9 = arith.constant 0 : index
    %12 = vector.load %arg5[%c0_8, %c0_9] : memref<1x8xf32, #tpu.memory_space<vmem>>, vector<1x8xf32>
    %13 = vector.broadcast %12 : vector<1x8xf32> to vector<256x8xf32>
    %14 = arith.mulf %13, %9 : vector<256x8xf32>
    %15 = arith.select %11, %9, %14 : vector<256x8xi1>, vector<256x8xf32>
    %c0_10 = arith.constant 0 : index
    %c0_11 = arith.constant 0 : index
    %16 = vector.load %arg9[%c0_10, %c0_11] : memref<1x8xf32, #tpu.memory_space<vmem>>, vector<1x8xf32>
    %cst_12 = arith.constant dense<0.000000e+00> : vector<8xf32>
    %17 = vector.multi_reduction <add>, %15, %cst_12 [0] : vector<256x8xf32> to vector<8xf32>
    %18 = vector.shape_cast %17 : vector<8xf32> to vector<1x8xf32>
    %19 = arith.addf %16, %18 : vector<1x8xf32>
    %c0_13 = arith.constant 0 : index
    %c0_14 = arith.constant 0 : index
    %20 = vector.load %arg9[%c0_13, %c0_14] : memref<1x8xf32, #tpu.memory_space<vmem>>, vector<1x8xf32>
    tpu.vector_store %arg9[%c0_13, %c0_14], %19 {strides = array<i32>} : memref<1x8xf32, #tpu.memory_space<vmem>>, vector<1x8xf32>,
    %c0_i32_15 = arith.constant 0 : i32
    %21 = arith.cmpi eq, %arg1, %c0_i32_15 : i32
    %22 = arith.extui %21 : i1 to i32
    %c0_i32_16 = arith.constant 0 : i32
    %23 = arith.cmpi ne, %22, %c0_i32_16 : i32
    scf.if %23 {
      %c0_17 = arith.constant 0 : index
      %c0_18 = arith.constant 0 : index
      %24 = vector.load %arg9[%c0_17, %c0_18] : memref<1x8xf32, #tpu.memory_space<vmem>>, vector<1x8xf32>
      %cst_19 = arith.constant 3.906250e-03 : f32
      %25 = vector.broadcast %cst_19 : f32 to vector<1x8xf32>
      %26 = arith.mulf %24, %25 : vector<1x8xf32>
      %c0_20 = arith.constant 0 : index
      %c0_21 = arith.constant 0 : index
      %27 = vector.load %arg6[%c0_20, %c0_21] : memref<8x32xf32, #tpu.memory_space<vmem>>, vector<8x32xf32>
      %cst_22 = arith.constant dense<0.000000e+00> : vector<1x32xf32>
      %28 = tpu.matmul %26, %27, %cst_22 {dimension_numbers = #tpu.dot_dimension_numbers<[1], [0], [0], [1], [0, 0, 1, 1], [], []>} : vector<1x8xf32>, vector<8x32xf32>, vector<1x32xf32> -> vector<1x32xf32>
      %c0_23 = arith.constant 0 : index
      %c0_24 = arith.constant 0 : index
      %29 = vector.load %arg7[%c0_23, %c0_24] : memref<1x32xf32, #tpu.memory_space<vmem>>, vector<1x32xf32>
      %30 = arith.addf %28, %29 : vector<1x32xf32>
      %c0_25 = arith.constant 0 : index
      %c0_26 = arith.constant 0 : index
      %c0_27 = arith.constant 0 : index
      %31 = vector.load %arg8[%c0_25, %c0_26, %c0_27] : memref<1x1x32xf32, #tpu.memory_space<vmem>>, vector<1x1x32xf32>
      %32 = vector.shape_cast %31 : vector<1x1x32xf32> to vector<1x32xf32>
      %33 = vector.shape_cast %30 : vector<1x32xf32> to vector<1x1x32xf32>
      tpu.vector_store %arg8[%c0_25, %c0_26, %c0_27], %33 {strides = array<i32>} : memref<1x1x32xf32, #tpu.memory_space<vmem>>, vector<1x1x32xf32>,
    } else {
    }
    return
  }
  func.func @transform_0(%arg0: i32, %arg1: i32) -> (i32, i32, i32) {
    %c0_i32 = arith.constant 0 : i32
    %c0_i32_0 = arith.constant 0 : i32
    return %arg0, %arg1, %c0_i32 : i32, i32, i32
  }
  func.func @transform_1(%arg0: i32, %arg1: i32) -> (i32, i32) {
    %c0_i32 = arith.constant 0 : i32
    %c0_i32_0 = arith.constant 0 : i32
    %c0_i32_1 = arith.constant 0 : i32
    return %c0_i32, %c0_i32_0 : i32, i32
  }
  func.func @transform_2(%arg0: i32, %arg1: i32) -> (i32, i32) {
    %c0_i32 = arith.constant 0 : i32
    %c0_i32_0 = arith.constant 0 : i32
    %c0_i32_1 = arith.constant 0 : i32
    return %c0_i32, %c0_i32_0 : i32, i32
  }
  func.func @transform_3(%arg0: i32, %arg1: i32) -> (i32, i32) {
    %c0_i32 = arith.constant 0 : i32
    %c0_i32_0 = arith.constant 0 : i32
    %c0_i32_1 = arith.constant 0 : i32
    return %c0_i32, %c0_i32_0 : i32, i32
  }
  func.func @transform_4(%arg0: i32, %arg1: i32) -> (i32, i32) {
    %c0_i32 = arith.constant 0 : i32
    %c0_i32_0 = arith.constant 0 : i32
    %c0_i32_1 = arith.constant 0 : i32
    return %c0_i32, %c0_i32_0 : i32, i32
  }
  func.func @transform_5(%arg0: i32, %arg1: i32) -> (i32, i32) {
    %c0_i32 = arith.constant 0 : i32
    %c0_i32_0 = arith.constant 0 : i32
    %c0_i32_1 = arith.constant 0 : i32
    return %c0_i32, %c0_i32_0 : i32, i32
  }
  func.func @transform_6(%arg0: i32, %arg1: i32) -> (i32, i32, i32) {
    %c0_i32 = arith.constant 0 : i32
    %c0_i32_0 = arith.constant 0 : i32
    %c0_i32_1 = arith.constant 0 : i32
    return %arg0, %c0_i32, %c0_i32_0 : i32, i32, i32
  }
}

</mosaic_0001>

<bundles_post_ra>
// kernel: tpu_custom_call.1
= control target key start
LH: loop header
LB: loop body
LE: loop exit
PB: predicated region body
PF: predicated region fallthrough
CT: control target
= control target key end

     0   :  { %11 = vsyncpa [#allocation4], 0  ;;  %s1587_s0 = inlined_call_operand.vmem [shape: bf16[2,256,27], index: 0, kind: input, shape index: {}]   ;;  %s1588_s1 = inlined_call_operand.vmem [shape: bf16[27,8], index: 1, kind: input, shape index: {}]   ;;  %s1589_s2 = inlined_call_operand.vmem [shape: f32[1,8], index: 2, kind: input, shape index: {}]   ;;  %s1590_s3 = inlined_call_operand.vmem [shape: f32[1,8], index: 3, kind: input, shape index: {}]   ;;  %s1591_s4 = inlined_call_operand.vmem [shape: f32[8,32], index: 4, kind: input, shape index: {}]   ;;  %s1592_s5 = inlined_call_operand.vmem [shape: f32[1,32], index: 5, kind: input, shape index: {}]   ;;  %s1593_s6 = inlined_call_operand.hbm [shape: f32[2,1,32], index: 6, kind: output, shape index: {}]  }
   0x1   :  { %13 = vsyncpa [#allocation4 + $0x1], 0  ;;  %s1284_s21 = smov 0   ;;  %s1286_s22 = smov 0  }
   0x2   :  { %s1288_s23 = smov 0   ;;  %s1290_s24 = smov 0  }
   0x3   :  { %s1292_s25 = smov 0   ;;  %s1294_s26 = smov 0  }
   0x4 LB: > { %s976_s27 = sadd.s32 4294967295, %s1243_s26   ;;  %s977_s28 = sadd.s32 4294967294, %s1243_s26   ;;  %s1243_s26 = sphi %s1294_s26, %s19_s26   ;;  %s1239_s25 = sphi %s1292_s25, %s1600_s25   ;;  %s1235_s24 = sphi %s1290_s24, %s1599_s24   ;;  %s1231_s23 = sphi %s1288_s23, %s1598_s23   ;;  %s1227_s22 = sphi %s1286_s22, %s1597_s22   ;;  %s1223_s21 = sphi %s1284_s21, %s1596_s21  }
   0x5   : > { %s31_s29 = sadd.s32 1, %s1239_s25  ;;  %s171_s30 = sadd.s32 1, %s1231_s23 }
   0x6   : > { %p33_p0 = scmp.ge.s32.totalorder %s31_s29, 2  ;;  %p181_p1 = scmp.ne.s32.totalorder %s1231_s23, %s1227_s22 }
   0x7   : > { %p182_p2 = scmp.eq.s32.totalorder %s976_s27, 1  ;;  %p187_p3 = scmp.ne.s32.totalorder %s1227_s22, %s1223_s21 }
   0x8   : > { %s1602_s29 = smov (%p33_p0, %s31_s29), 0  ;;  %p188_p5 = scmp.eq.s32.totalorder %s977_s28, 1 }
   0x9   : > { %p1324_p4 = por %p182_p2, %p181_p1  ;;  %s168_s8 = ssub.s32 %s1239_s25, %s1602_s29 }
   0xa   : > { %p980_p6 = scmp.ge.s32.totalorder %s1243_s26, 1  ;;  %p169_p7 = scmp.eq.s32.totalorder %s168_s8, 0 }
   0xb   : > { %p1331_p8 = por %p188_p5, %p187_p3  ;;  %p234_p9 = scmp.lt.s32.totalorder %s1243_s26, 3 }
   0xc   : > { %s1337_s10 = scalar_select %p169_p7, %s1231_s23, %s171_s30  }
   0xd   : > { %p235_p10 = pnand %p980_p6, %p234_p9 }
   0xe   : > { %v1147_v0 = vld [vmem:[%s1588_s1] sm:$0xff] (!%p235_p10)   ;;  %vm467_vm0 = vcmask (!%p235_p10), 1044480   ;;  %v1148_v1 = vld [vmem:[%s1588_s1 + $0x8] sm:$0x3f] (!%p235_p10)   ;;  %vm468_vm1 = vcmask (!%p235_p10), 1045504   ;;  %p268_p11 = scmp.lt.s32.totalorder (!%p235_p10), %s1235_s24, 1 }
   0xf   : > { %238 = sbr.rel (%p235_p10) target bundleno = 563 (0x233), region = 44  ;;  %1044 = vmatprep.subr.bf16.mxu0 (!%p235_p10), %v1147_v0  ;;  %1085 = vmatprep.subr.bf16.mxu1 (!%p235_p10), %v1147_v0  ;;  %v1245_v2 = vmov (!%p235_p10), 65535   ;;  %vm418_vm2 = vcmask (!%p235_p10), 220160   ;;  %vm282_vm3 = vcmask (!%p235_p10), 57344   ;;  %v1246_v22 = vmov (!%p235_p10), 0.0   ;;  %v817_v23 = vld [vmem:[%s1591_s4] sm:$0xff] (!%p235_p10) }
  0x10   : > { %1045 = vmatpush3.bf16.msra.mxu0 (!%p235_p10), %v1147_v0  ;;  %v469_v3 = vsel (!%p235_p10), %vm467_vm0, 4294967295, %v1245_v2  ;;  %1087 = vmatpush3.bf16.msra.mxu1 (!%p235_p10), %v1147_v0  ;;  %283 = vst.msk [vmem:[#allocation2] sm:$0x1] (!%p235_p10), %vm282_vm3, %v1246_v22  ;;  %vm1247_vm4 = vmmov (!%p235_p10), 0   ;;  %v1391_v24 = vld [vmem:[%s1589_s2] ss:$0 sm:$0xff] (!%p235_p10) }
  0x11   : > { %v470_v4 = vsel (!%p235_p10), %vm468_vm1, %v469_v3, 0  ;;  %v1397_v27 = vld [vmem:[%s1590_s3] ss:$0 sm:$0xff] (!%p235_p10)  ;;  %vm739_vm7 = vcmask (!%p235_p10), 64512   ;;  %s265_s12 = sand.u32 (!%p235_p10), 1, %s1227_s22  }
  0x12   : > { %v472_v5 = vand.u32 (!%p235_p10), %v1148_v1, %v470_v4  ;;  %s895_s27 = scalar_lea.sflag (!%p235_p10), [#allocation4], %s265_s12 }
  0x14   : > { %1046 = vmatprep.subr.bf16.mxu0 (!%p235_p10), %v472_v5  ;;  %1086 = vmatprep.subr.bf16.mxu1 (!%p235_p10), %v472_v5 }
  0x15   : > { %1047 = vmatpush3.bf16.msra.mxu0 (!%p235_p10), %v472_v5  ;;  %1088 = vmatpush3.bf16.msra.mxu1 (!%p235_p10), %v472_v5 }
  0x16   : > { %s269_s15 = scalar_select %p268_p11, %s1235_s24, 1  ;;  %1080 = vmatprep.subr.mxu1 %v1246_v22 }
  0x18   : > { %s1023_s16 = sshll.u32 %s269_s15, 7  ;;  %s1020_s15 = sshll.u32 %s1235_s24, 4 }
  0x19   : > { %s1350_s19 = scalar_lea.vmem %s1587_s0, %s1023_s16  ;;  %s266_s16 = scalar_lea.vmem [#allocation3], %s265_s12 }
  0x1a   : > { %v1149_v6 = vld [vmem:[%s1350_s19] sm:$0xff]   ;;  %v1150_v7 = vld [vmem:[%s1350_s19 + $0x8] sm:$0xff]   ;;  %v1151_v8 = vld [vmem:[%s1350_s19 + $0x10] sm:$0xff]   ;;  %s907_s17 = sshll.u32 %s266_s16, 4  ;;  %s1540_s20 = scalar_lea.hbm %s1593_s6, %s1020_s15  ;;  %s1542_s17 = int_to_ptr.vmem [resolvable:$true] %s907_s17 }
  0x1b   : > { %1048 = vmatprep.mubr.msk.bf16.mxu0 %vm418_vm2, %v1149_v6  ;;  %v1152_v9 = vld [vmem:[%s1350_s19 + $0x18] sm:$0xff]   ;;  %v1153_v10 = vld [vmem:[%s1350_s19 + $0x20] sm:$0xff]   ;;  %v1159_v11 = vld [vmem:[%s1350_s19 + $0x50] sm:$0xff]   ;;  %s1165_s28 = scalar_lea.vmem %s1542_s17, 16  ;;  %s1248_s24 = smov [#allocation3]  }
  0x1c   : > { %1049 = vmatmul.mubr.msk.bf16.vlgmr.msra.gmra.mrb[0].mxu0 %vm418_vm2, %v1150_v7  ;;  %v1160_v12 = vld [vmem:[%s1350_s19 + $0x58] sm:$0xff]   ;;  %1068 = vmatprep.mubr.msk.bf16.mxu1 %vm418_vm2, %v1159_v11  ;;  %v1161_v13 = vld [vmem:[%s1350_s19 + $0x60] sm:$0xff]   ;;  %v1154_v14 = vld [vmem:[%s1350_s19 + $0x28] sm:$0xff]   ;;  %p1166_p12 = scmp.ne.s32.totalorder %s1542_s17, %s1165_s28  ;;  %s1169_s30 = sshll.u32 %s1248_s24, 4  ;;  %s1170_s30 = int_to_ptr.vmem [resolvable:$false] %s1169_s30 }
  0x1d   : > { %1052 = vmatprep.mubr.msk.bf16.mxu0 %vm418_vm2, %v1151_v8  ;;  %1069 = vmatmul.mubr.msk.bf16.vlgmr.msra.gmra.mrb[0].mxu1 %vm418_vm2, %v1160_v12  ;;  %v1155_v15 = vld [vmem:[%s1350_s19 + $0x30] sm:$0xff]   ;;  %v1162_v16 = vld [vmem:[%s1350_s19 + $0x68] sm:$0xff]   ;;  %v1156_v18 = vld [vmem:[%s1350_s19 + $0x38] sm:$0xff]   ;;  %s1171_s8 = scalar_lea.vmem %s1170_s30, 32  ;;  %p1172_p1 = scmp.lt.s32.totalorder %s1542_s17, %s1170_s30 }
  0x1e   : > { %1072 = vmatprep.mubr.msk.bf16.mxu1 %vm418_vm2, %v1161_v13  ;;  %v1163_v17 = vld [vmem:[%s1350_s19 + $0x70] sm:$0xff]   ;;  %v1157_v19 = vld [vmem:[%s1350_s19 + $0x40] sm:$0xff]   ;;  %v1164_v20 = vld [vmem:[%s1350_s19 + $0x78] sm:$0xff]   ;;  %1081 = vmatpush3.msra.mxu1 %v817_v23  ;;  %p1167_p13 = pnand %p1166_p12, %p1324_p4  ;;  %p1173_p2 = scmp.lt.s32.totalorder %s1171_s8, %s1165_s28 }
  0x1f   : > { %v1158_v21 = vld [vmem:[%s1350_s19 + $0x48] sm:$0xff]  }
  0x20   : > { %p1168_p0 = pneg %p1167_p13  ;;  %p1174_p3 = por %p1173_p2, %p1172_p1 }
  0x22   : > { %p1175_p5 = pnand %p1174_p3, %p1168_p0 }
  0x24   : > { %1053 = vmatmul.mubr.msk.bf16.gmra.mrb[4].mxu0 %vm418_vm2, %v1152_v9 }
  0x25   : > { %1056 = vmatprep.mubr.msk.bf16.mxu0 %vm418_vm2, %v1153_v10  ;;  %1073 = vmatmul.mubr.msk.bf16.gmra.mrb[4].mxu1 %vm418_vm2, %v1162_v16 }
  0x26   : > { %1076 = vmatprep.mubr.msk.bf16.mxu1 %vm418_vm2, %v1163_v17 }
  0x2c   : > { %1057 = vmatmul.mubr.msk.bf16.gmra.mrb[8].mxu0 %vm418_vm2, %v1154_v14 }
  0x2d   : > { %1060 = vmatprep.mubr.msk.bf16.mxu0 %vm418_vm2, %v1155_v15  ;;  %1077 = vmatmul.mubr.msk.bf16.gmra.mrb[8].mxu1 %vm418_vm2, %v1164_v20 }
  0x2e   : > { %1082 = vmatprep.mubr.msk.f32.mxu1 %vm1247_vm4, %v1246_v22 }
  0x34   : > { %1061 = vmatmul.mubr.msk.bf16.gmra.mrb[12].mxu0 %vm418_vm2, %v1156_v18 }
  0x35   : > { %1064 = vmatprep.mubr.msk.bf16.mxu0 %vm418_vm2, %v1157_v19 }
  0x3c   : > { %1065 = vmatmul.mubr.msk.bf16.gmra.mrb[16].mxu0 %vm418_vm2, %v1158_v21 }
  0xef   : > { %v1050_v25 = vpop.f32.mrb[0].mxu0 }
  0xf0   : > { %v517_v26 = vadd.f32 %v1050_v25, %v1391_v24  ;;  %v508_v28 = vpop.f32.mrb[1].mxu0  ;;  %v1410_v50 = vpop.f32.mrb[0].mxu1 }
  0xf1   : > { %v509_v29 = vadd.f32 %v1391_v24, %v508_v28  ;;  %v1051_v30 = vpop.f32.mrb[2].mxu0  ;;  %v1414_v54 = vpop.f32.mrb[1].mxu1 }
  0xf2   : > { %v520_v31 = vadd.f32 %v1051_v30, %v1391_v24  ;;  %v511_v32 = vpop.f32.mrb[3].mxu0  ;;  %v676_v33 = vmul.f32 %v1397_v27, %v517_v26  ;;  %vm637_vm6 = vcmp.gt.f32.partialorder %v517_v26, 0.0  ;;  %v1418_v58 = vpop.f32.mrb[2].mxu1 }
  0xf3   : > { %vm635_vm5 = vcmp.gt.f32.partialorder %v509_v29, 0.0  ;;  %v674_v34 = vmul.f32 %v1397_v27, %v509_v29  ;;  %v512_v35 = vadd.f32 %v1391_v24, %v511_v32  ;;  %v1422_v61 = vpop.f32.mrb[3].mxu1 }
  0xf4   : > { %v677_v37 = vmul.f32 %v1397_v27, %v520_v31  ;;  %vm638_vm9 = vcmp.gt.f32.partialorder %v520_v31, 0.0  ;;  %v708_v39 = vsel %vm637_vm6, %v517_v26, %v676_v33 }
  0xf5   : > { %v706_v36 = vsel %vm635_vm5, %v509_v29, %v674_v34  ;;  %vm636_vm8 = vcmp.gt.f32.partialorder %v512_v35, 0.0  ;;  %v675_v38 = vmul.f32 %v1397_v27, %v512_v35  ;;  %v743_v51 = vsel %vm739_vm7, %v708_v39, 0.0 }
  0xf6   : > { %v740_v42 = vsel %vm739_vm7, %v706_v36, 0.0  ;;  %v709_v46 = vsel %vm638_vm9, %v520_v31, %v677_v37 }
  0xf7   : > { %v707_v40 = vsel %vm636_vm8, %v512_v35, %v675_v38  ;;  %v1054_v41 = vpop.f32.mrb[4].mxu0  ;;  %v745_v59 = vsel %vm739_vm7, %v709_v46, 0.0 }
  0xf8   : > { %v741_v43 = vsel %vm739_vm7, %v707_v40, 0.0  ;;  %v533_v44 = vadd.f32 %v1054_v41, %v1391_v24  ;;  %v524_v45 = vpop.f32.mrb[5].mxu0  ;;  %v1430_v13 = vpop.f32.mrb[4].mxu1 }
  0xf9   : > { %v742_v47 = vadd.f32 %v741_v43, %v740_v42  ;;  %v525_v48 = vadd.f32 %v1391_v24, %v524_v45  ;;  %v1055_v49 = vpop.f32.mrb[6].mxu0  ;;  %v1433_v17 = vpop.f32.mrb[5].mxu1 }
  0xfa   : > { %v536_v52 = vadd.f32 %v1055_v49, %v1391_v24  ;;  %v527_v53 = vpop.f32.mrb[7].mxu0  ;;  %vm641_vm11 = vcmp.gt.f32.partialorder %v533_v44, 0.0  ;;  %v680_v60 = vmul.f32 %v1397_v27, %v533_v44  ;;  %v1438_v21 = vpop.f32.mrb[6].mxu1 }
  0xfb   : > { %v744_v55 = vadd.f32 %v743_v51, %v742_v47  ;;  %vm639_vm10 = vcmp.gt.f32.partialorder %v525_v48, 0.0  ;;  %v678_v56 = vmul.f32 %v1397_v27, %v525_v48  ;;  %v528_v57 = vadd.f32 %v1391_v24, %v527_v53  ;;  %v1442_v26 = vpop.f32.mrb[7].mxu1 }
  0xfc   : > { %v681_v0 = vmul.f32 %v1397_v27, %v536_v52  ;;  %vm642_vm13 = vcmp.gt.f32.partialorder %v536_v52, 0.0  ;;  %v712_v5 = vsel %vm641_vm11, %v533_v44, %v680_v60 }
  0xfd   : > { %v710_v62 = vsel %vm639_vm10, %v525_v48, %v678_v56  ;;  %v746_v63 = vadd.f32 %v745_v59, %v744_v55  ;;  %vm640_vm12 = vcmp.gt.f32.partialorder %v528_v57, 0.0  ;;  %v679_v2 = vmul.f32 %v1397_v27, %v528_v57 }
  0xfe   : > { %v747_v1 = vsel %vm739_vm7, %v710_v62, 0.0  ;;  %v713_v9 = vsel %vm642_vm13, %v536_v52, %v681_v0  ;;  %v751_v18 = vsel %vm739_vm7, %v712_v5, 0.0 }
  0xff   : > { %v748_v3 = vadd.f32 %v747_v1, %v746_v63  ;;  %v1058_v4 = vpop.f32.mrb[8].mxu0  ;;  %v711_v6 = vsel %vm640_vm12, %v528_v57, %v679_v2  ;;  %v753_v22 = vsel %vm739_vm7, %v713_v9, 0.0 }
 0x100   : > { %v549_v7 = vadd.f32 %v1058_v4, %v1391_v24  ;;  %v540_v8 = vpop.f32.mrb[9].mxu0  ;;  %v749_v10 = vsel %vm739_vm7, %v711_v6, 0.0  ;;  %v1450_v43 = vpop.f32.mrb[8].mxu1 }
 0x101   : > { %v541_v11 = vadd.f32 %v1391_v24, %v540_v8  ;;  %v1059_v12 = vpop.f32.mrb[10].mxu0  ;;  %v750_v14 = vadd.f32 %v749_v10, %v748_v3  ;;  %v1453_v47 = vpop.f32.mrb[9].mxu1 }
 0x102   : > { %v552_v15 = vadd.f32 %v1059_v12, %v1391_v24  ;;  %v543_v16 = vpop.f32.mrb[11].mxu0  ;;  %vm645_vm15 = vcmp.gt.f32.partialorder %v549_v7, 0.0  ;;  %v684_v25 = vmul.f32 %v1397_v27, %v549_v7  ;;  %v1458_v52 = vpop.f32.mrb[10].mxu1 }
 0x103   : > { %vm643_vm14 = vcmp.gt.f32.partialorder %v541_v11, 0.0  ;;  %v682_v19 = vmul.f32 %v1397_v27, %v541_v11  ;;  %v544_v20 = vadd.f32 %v1391_v24, %v543_v16  ;;  %v752_v23 = vadd.f32 %v751_v18, %v750_v14  ;;  %v1462_v57 = vpop.f32.mrb[11].mxu1 }
 0x104   : > { %v685_v29 = vmul.f32 %v1397_v27, %v552_v15  ;;  %vm646_vm1 = vcmp.gt.f32.partialorder %v552_v15, 0.0  ;;  %v716_v35 = vsel %vm645_vm15, %v549_v7, %v684_v25 }
 0x105   : > { %v714_v28 = vsel %vm643_vm14, %v541_v11, %v682_v19  ;;  %vm644_vm0 = vcmp.gt.f32.partialorder %v544_v20, 0.0  ;;  %v683_v30 = vmul.f32 %v1397_v27, %v544_v20  ;;  %v754_v31 = vadd.f32 %v753_v22, %v752_v23 }
 0x106   : > { %v755_v32 = vsel %vm739_vm7, %v714_v28, 0.0  ;;  %v717_v40 = vsel %vm646_vm1, %v552_v15, %v685_v29  ;;  %v759_v48 = vsel %vm739_vm7, %v716_v35, 0.0  ;;  %v589_v23 = vadd.f32 %v1391_v24, %v1414_v54 }
 0x107   : > { %v715_v33 = vsel %vm644_vm0, %v544_v20, %v683_v30  ;;  %v1062_v34 = vpop.f32.mrb[12].mxu0  ;;  %v756_v36 = vadd.f32 %v755_v32, %v754_v31  ;;  %v761_v53 = vsel %vm739_vm7, %v717_v40, 0.0  ;;  %v592_v32 = vadd.f32 %v1391_v24, %v1422_v61 }
 0x108   : > { %v757_v37 = vsel %vm739_vm7, %v715_v33, 0.0  ;;  %v565_v38 = vadd.f32 %v1062_v34, %v1391_v24  ;;  %v556_v39 = vpop.f32.mrb[13].mxu0  ;;  %v597_v34 = vadd.f32 %v1410_v50, %v1391_v24  ;;  %vm655_vm12 = vcmp.gt.f32.partialorder %v589_v23, 0.0 }
 0x109   : > { %v557_v41 = vadd.f32 %v1391_v24, %v556_v39  ;;  %v1063_v42 = vpop.f32.mrb[14].mxu0  ;;  %v758_v44 = vadd.f32 %v757_v37, %v756_v36  ;;  %v694_v37 = vmul.f32 %v1397_v27, %v589_v23  ;;  %v600_v40 = vadd.f32 %v1418_v58, %v1391_v24 }
 0x10a   : > { %v568_v45 = vadd.f32 %v1063_v42, %v1391_v24  ;;  %v559_v46 = vpop.f32.mrb[15].mxu0  ;;  %vm649_vm4 = vcmp.gt.f32.partialorder %v565_v38, 0.0  ;;  %v688_v56 = vmul.f32 %v1397_v27, %v565_v38  ;;  %vm656_vm13 = vcmp.gt.f32.partialorder %v592_v32, 0.0 }
 0x10b   : > { %vm647_vm2 = vcmp.gt.f32.partialorder %v557_v41, 0.0  ;;  %v686_v49 = vmul.f32 %v1397_v27, %v557_v41  ;;  %v560_v51 = vadd.f32 %v1391_v24, %v559_v46  ;;  %v760_v55 = vadd.f32 %v759_v48, %v758_v44 }
 0x10c   : > { %v689_v60 = vmul.f32 %v1397_v27, %v568_v45  ;;  %vm650_vm6 = vcmp.gt.f32.partialorder %v568_v45, 0.0  ;;  %v720_v3 = vsel %vm649_vm4, %v565_v38, %v688_v56  ;;  %v696_v50 = vmul.f32 %v1397_v27, %v597_v34 }
 0x10d   : > { %v718_v59 = vsel %vm647_vm2, %v557_v41, %v686_v49  ;;  %vm648_vm5 = vcmp.gt.f32.partialorder %v560_v51, 0.0  ;;  %v687_v62 = vmul.f32 %v1397_v27, %v560_v51  ;;  %v762_v63 = vadd.f32 %v761_v53, %v760_v55 }
 0x10e   : > { %v763_v0 = vsel %vm739_vm7, %v718_v59, 0.0  ;;  %v721_v8 = vsel %vm650_vm6, %v568_v45, %v689_v60  ;;  %v767_v15 = vsel %vm739_vm7, %v720_v3, 0.0  ;;  %v695_v41 = vmul.f32 %v1397_v27, %v592_v32 }
 0x10f   : > { %v719_v1 = vsel %vm648_vm5, %v560_v51, %v687_v62  ;;  %v1066_v2 = vpop.f32.mrb[16].mxu0  ;;  %v764_v4 = vadd.f32 %v763_v0, %v762_v63  ;;  %v769_v19 = vsel %vm739_vm7, %v721_v8, 0.0  ;;  %v726_v44 = vsel %vm655_vm12, %v589_v23, %v694_v37 }
 0x110   : > { %v765_v5 = vsel %vm739_vm7, %v719_v1, 0.0  ;;  %v581_v6 = vadd.f32 %v1066_v2, %v1391_v24  ;;  %v572_v7 = vpop.f32.mrb[17].mxu0  ;;  %v605_v45 = vadd.f32 %v1391_v24, %v1433_v17  ;;  %vm657_vm14 = vcmp.gt.f32.partialorder %v597_v34, 0.0 }
 0x111   : > { %v573_v9 = vadd.f32 %v1391_v24, %v572_v7  ;;  %v1067_v10 = vpop.f32.mrb[18].mxu0  ;;  %v766_v11 = vadd.f32 %v765_v5, %v764_v4  ;;  %v697_v49 = vmul.f32 %v1397_v27, %v600_v40  ;;  %v727_v51 = vsel %vm656_vm13, %v592_v32, %v695_v41  ;;  %v738_v41 = vld [vmem:[#allocation2] sm:$0x1] }
 0x112   : > { %v584_v12 = vadd.f32 %v1067_v10, %v1391_v24  ;;  %v575_v14 = vpop.f32.mrb[19].mxu0  ;;  %v692_v22 = vmul.f32 %v1397_v27, %v581_v6  ;;  %vm653_vm9 = vcmp.gt.f32.partialorder %v581_v6, 0.0  ;;  %v608_v58 = vadd.f32 %v1391_v24, %v1442_v26 }
 0x113   : > { %vm651_vm8 = vcmp.gt.f32.partialorder %v573_v9, 0.0  ;;  %v690_v16 = vmul.f32 %v1397_v27, %v573_v9  ;;  %v576_v18 = vadd.f32 %v1391_v24, %v575_v14  ;;  %v768_v20 = vadd.f32 %v767_v15, %v766_v11 }
 0x114   : > { %v693_v31 = vmul.f32 %v1397_v27, %v584_v12  ;;  %vm654_vm11 = vcmp.gt.f32.partialorder %v584_v12, 0.0  ;;  %v724_v35 = vsel %vm653_vm9, %v581_v6, %v692_v22  ;;  %v779_v53 = vsel %vm739_vm7, %v726_v44, 0.0 }
 0x115   : > { %v722_v25 = vsel %vm651_vm8, %v573_v9, %v690_v16  ;;  %vm652_vm10 = vcmp.gt.f32.partialorder %v576_v18, 0.0  ;;  %v691_v28 = vmul.f32 %v1397_v27, %v576_v18  ;;  %v770_v29 = vadd.f32 %v769_v19, %v768_v20 }
 0x116   : > { %v771_v30 = vsel %vm739_vm7, %v722_v25, 0.0  ;;  %v725_v38 = vsel %vm654_vm11, %v584_v12, %v693_v31  ;;  %v775_v61 = vsel %vm739_vm7, %v724_v35, 0.0  ;;  %vm658_vm15 = vcmp.gt.f32.partialorder %v600_v40, 0.0 }
 0x117   : > { %v723_v33 = vsel %vm652_vm10, %v576_v18, %v691_v28  ;;  %v772_v54 = vadd.f32 %v771_v30, %v770_v29  ;;  %v777_v46 = vsel %vm739_vm7, %v725_v38, 0.0  ;;  %v728_v55 = vsel %vm657_vm14, %v597_v34, %v696_v50 }
 0x118   : > { %v773_v36 = vsel %vm739_vm7, %v723_v33, 0.0  ;;  %v613_v59 = vadd.f32 %v1430_v13, %v1391_v24  ;;  %v698_v17 = vmul.f32 %v1397_v27, %v605_v45  ;;  %v781_v60 = vsel %vm739_vm7, %v727_v51, 0.0 }
 0x119   : > { %v774_v39 = vadd.f32 %v773_v36, %v772_v54  ;;  %vm659_vm0 = vcmp.gt.f32.partialorder %v605_v45, 0.0  ;;  %v729_v62 = vsel %vm658_vm15, %v600_v40, %v697_v49  ;;  %v616_v0 = vadd.f32 %v1438_v21, %v1391_v24 }
 0x11a   : > { %v699_v26 = vmul.f32 %v1397_v27, %v608_v58  ;;  %v783_v1 = vsel %vm739_vm7, %v728_v55, 0.0  ;;  %vm660_vm1 = vcmp.gt.f32.partialorder %v608_v58, 0.0  ;;  %v700_v3 = vmul.f32 %v1397_v27, %v613_v59 }
 0x11b   : > { %v776_v42 = vadd.f32 %v775_v61, %v774_v39  ;;  %v730_v4 = vsel %vm659_vm0, %v605_v45, %v698_v17  ;;  %v621_v13 = vadd.f32 %v1391_v24, %v1453_v47  ;;  %v785_v5 = vsel %vm739_vm7, %v729_v62, 0.0  ;;  %v818_v45 = vld [vmem:[%s1592_s5] sm:$0x1] }
 0x11c   : > { %vm661_vm2 = vcmp.gt.f32.partialorder %v613_v59, 0.0  ;;  %v701_v7 = vmul.f32 %v1397_v27, %v616_v0  ;;  %v731_v8 = vsel %vm660_vm1, %v608_v58, %v699_v26  ;;  %v624_v21 = vadd.f32 %v1391_v24, %v1462_v57 }
 0x11d   : > { %v778_v48 = vadd.f32 %v777_v46, %v776_v42  ;;  %v787_v9 = vsel %vm739_vm7, %v730_v4, 0.0  ;;  %vm662_vm4 = vcmp.gt.f32.partialorder %v616_v0, 0.0  ;;  %v732_v10 = vsel %vm661_vm2, %v613_v59, %v700_v3 }
 0x11e   : > { %v629_v12 = vadd.f32 %v1450_v43, %v1391_v24  ;;  %v702_v47 = vmul.f32 %v1397_v27, %v621_v13  ;;  %v789_v14 = vsel %vm739_vm7, %v731_v8, 0.0  ;;  %vm663_vm5 = vcmp.gt.f32.partialorder %v621_v13, 0.0 }
 0x11f   : > { %v780_v56 = vadd.f32 %v779_v53, %v778_v48  ;;  %v733_v15 = vsel %vm662_vm4, %v616_v0, %v701_v7  ;;  %v632_v18 = vadd.f32 %v1458_v52, %v1391_v24  ;;  %v703_v57 = vmul.f32 %v1397_v27, %v624_v21 }
 0x120   : > { %v791_v19 = vsel %vm739_vm7, %v732_v10, 0.0  ;;  %vm664_vm6 = vcmp.gt.f32.partialorder %v624_v21, 0.0  ;;  %v704_v22 = vmul.f32 %v1397_v27, %v629_v12  ;;  %v734_v23 = vsel %vm663_vm5, %v621_v13, %v702_v47 }
 0x121   : > { %v782_v63 = vadd.f32 %v781_v60, %v780_v56  ;;  %v793_v43 = vsel %vm739_vm7, %v733_v15, 0.0  ;;  %vm665_vm8 = vcmp.gt.f32.partialorder %v629_v12, 0.0  ;;  %v705_v28 = vmul.f32 %v1397_v27, %v632_v18 }
 0x122   : > { %v735_v29 = vsel %vm664_vm6, %v624_v21, %v703_v57  ;;  %v795_v30 = vsel %vm739_vm7, %v734_v23, 0.0  ;;  %vm666_vm9 = vcmp.gt.f32.partialorder %v632_v18, 0.0  ;;  %v736_v24 = vsel %vm665_vm8, %v629_v12, %v704_v22 }
 0x123   : > { %v784_v2 = vadd.f32 %v783_v1, %v782_v63  ;;  %v797_v31 = vsel %vm739_vm7, %v735_v29, 0.0  ;;  %v737_v32 = vsel %vm666_vm9, %v632_v18, %v705_v28  ;;  %v799_v34 = vsel %vm739_vm7, %v736_v24, 0.0 }
 0x124   : > { %v801_v54 = vsel %vm739_vm7, %v737_v32, 0.0  ;;  %vm892_vm10 = vcmask 253952  }
 0x125   : > { %v786_v6 = vadd.f32 %v785_v5, %v784_v2 }
 0x127   : > { %v788_v11 = vadd.f32 %v787_v9, %v786_v6 }
 0x129   : > { %v790_v16 = vadd.f32 %v789_v14, %v788_v11 }
 0x12b   : > { %v792_v20 = vadd.f32 %v791_v19, %v790_v16 }
 0x12d   : > { %v794_v25 = vadd.f32 %v793_v43, %v792_v20 }
 0x12f   : > { %v796_v52 = vadd.f32 %v795_v30, %v794_v25 }
 0x131   : > { %v798_v33 = vadd.f32 %v797_v31, %v796_v52 }
 0x133   : > { %v800_v35 = vadd.f32 %v799_v34, %v798_v33 }
 0x135   : > { %v802_v36 = vadd.f32 %v801_v54, %v800_v35 }
 0x137   : > { %v803_v37 = vrot.slane %v802_v36, 4 }
 0x139   : > { %v804_v27 = vadd.f32 %v803_v37, %v802_v36 }
 0x13b   : > { %v805_v38 = vrot.slane %v804_v27, 2 }
 0x13d   : > { %v806_v39 = vadd.f32 %v805_v38, %v804_v27 }
 0x13f   : > { %v807_v40 = vrot.slane %v806_v39, 1 }
 0x141   : > { %v808_v61 = vadd.f32 %v807_v40, %v806_v39 }
 0x143   : > { %v809_v42 = vadd.f32 %v808_v61, %v738_v41 }
 0x145   : > { %811 = vst.msk [vmem:[#allocation2] sm:$0x1] %vm282_vm3, %v809_v42 }
 0x14c   : > { %v815_v50 = vld [vmem:[#allocation2] sm:$0x1] }
 0x14d   : > { %v816_v44 = vmul.f32 0.00390625, %v815_v50 }
 0x14f   : > { %1083 = vmatmul.mubr.msk.f32.vlgmr.msra.gmra.mrb[12].mxu1 %vm739_vm7, %v816_v44 }
 0x222   : > { %v888_v46 = vpop.f32.mrb[12].mxu1 }
 0x223   : > { %v889_v48 = vadd.f32 %v888_v46, %v818_v45  ;;  %v1084_v49 = vpop.f32.mrb[13].mxu1 }
 0x225   : > { %893 = vst.msk [vmem:[%s266_s16] sm:$0x1] %vm892_vm10, %v889_v48 }
 0x226   : > { %1178 = shalt.err (!%p1175_p5)
}
 0x227   : > { %s1179_s11 = scalar_lea.hbm %s1540_s20, 16  ;;  %s1183_s14 = scalar_lea.hbm %s1593_s6, 32 }
 0x228   : > { %p1180_p6 = scmp.ne.s32.totalorder %s1540_s20, %s1179_s11  ;;  %p1184_p10 = scmp.lt.u32.totalorder %s1540_s20, %s1593_s6 }
 0x229   : > { %p1185_p11 = scmp.lt.u32.totalorder %s1183_s14, %s1179_s11  ;;  %p1187_p13 = scmp.lt.u32.totalorder %s1179_s11, %s1540_s20 }
 0x22a   : > { %p1181_p7 = pnand %p1180_p6, %p1324_p4 }
 0x22b   : > { %p1186_p12 = por %p1185_p11, %p1184_p10 }
 0x22c   : > { %p1182_p9 = pneg %p1181_p7 }
 0x22d   : > { %p1188_p0 = por %p1187_p13, %p1186_p12 }
 0x22f   : > { %p1189_p1 = pnand %p1188_p0, %p1182_p9 }
 0x231   : > { %1192 = shalt.err (!%p1189_p1)
}
 0x232   : > { %1089 = dma.vmem_to_hbm [thread:$0]  (%p1324_p4), %s1542_s17, 16, %s1540_s20, %s895_s27  }
 0x233 PF: > { %p1095_p2 = scmp.ge.s32.totalorder %s1243_s26, 2  ;;  %s919_s18 = sand.u32 1, %s1223_s21  }
 0x234   : > { %s920_s19 = scalar_lea.sflag [#allocation4], %s919_s18 }
 0x235   : > { %p1092_p3 = pnand %p1095_p2, %p1331_p8 }
 0x237   : > { %1218 = dma.done.wait (!%p1092_p3), %s920_s19, 16  }
 0x238   : > { %1220 = vsyncadd (!%p1092_p3), %s920_s19, 4294967280  ;;  %s19_s26 = sadd.s32 1, %s1243_s26   ;;  %s1596_s21 = smov %s1227_s22 }
 0x239   : > { %p16_p5 = scmp.ge.s32.totalorder %s19_s26, 4   ;;  %s1597_s22 = smov %s1231_s23 }
 0x23a   : > { %s1598_s23 = smov %s1337_s10  ;;  %s1599_s24 = smov %s1239_s25 }
 0x23b   : > { %s1600_s25 = smov %s1602_s29  ;;  %18 = sbr.rel (!%p16_p5) target bundleno = 4 (0x4), region = 87 }
 0x242   :  { %924 = vsyncpa [#allocation4], 1 }
 0x243   :  { %926 = vsyncpa [#allocation4 + $0x1], 1 }

</bundles_post_ra>
